<compile_context>
chip_gen: v7x
topology: tpu7x:2x2x1
jax: 0.10.0
libtpu: 0.0.40
codegen_flags: <defaults>
</compile_context>

<pallas_src>
import math
import functools

import jax
import jax.numpy as jnp
import numpy as np
from jax.experimental import pallas as pl
from jax.experimental.pallas import tpu as pltpu


# ------------------------------ fused kernel --------------------------------


def _fused_mha_kernel(x_ref, wqkv_ref, bqkv_ref, wo_ref, bo_ref, o_ref,
                      *, n_heads, d_head, scale):
    # Block shapes: x (1, T, E), wqkv (E, 3E), bqkv (1, 3E), wo (E, E), bo (1, E)
    T = x_ref.shape[1]
    E = x_ref.shape[2]
    H = n_heads
    D = d_head

    x = x_ref[0]  # (T, E)

    # Fused QKV projection: one (T, E) @ (E, 3E) matmul, 96-lane output.
    qkv = (jnp.dot(x, wqkv_ref[...], preferred_element_type=jnp.float32)
           + bqkv_ref[...])                       # (T, 3E)
    q = qkv[:, :E]                                # (T, E)
    k = qkv[:, E:2 * E]                           # (T, E)
    v = qkv[:, 2 * E:]                            # (T, E)

    # Causal mask, built once (hoisted out of the per-head loop).
    row = jax.lax.broadcasted_iota(jnp.int32, (T, T), 0)
    col = jax.lax.broadcasted_iota(jnp.int32, (T, T), 1)
    causal = col > row                            # True above the diagonal

    # Per-d_head attention (D slices of width H along the lane axis).  The
    # module's split() makes d_head the batch-like axis and contracts over
    # n_heads, scaled by 1/sqrt(n_heads).
    ctx_cols = []
    for d in range(D):
        q_d = q[:, d * H:(d + 1) * H]             # (T, H)
        k_d = k[:, d * H:(d + 1) * H]             # (T, H)
        v_d = v[:, d * H:(d + 1) * H]             # (T, H)

        # scores: contract last axes of q_d/k_d directly (no k.T materialized)
        s = jax.lax.dot_general(
            q_d, k_d,
            dimension_numbers=(((1,), (1,)), ((), ())),
            preferred_element_type=jnp.float32,
        ) * scale                                 # (T, T)
        s = jnp.where(causal, -jnp.inf, s)

        # numerically-stable softmax in f32 (safe on v5e: no bf16 VPU math)
        m = jnp.max(s, axis=-1, keepdims=True)
        p = jnp.exp(s - m)
        l = jnp.sum(p, axis=-1, keepdims=True)
        w = p * pl.reciprocal(l, approx=True)     # EUP slot, VPU stays free

        ctx_cols.append(
            jnp.dot(w, v_d, preferred_element_type=jnp.float32)  # (T, H)
        )

    # Merge heads back to the lane-dense (T, E) layout (== transpose(1,2) +
    # contiguous().view in the PyTorch module).
    ctx = jnp.concatenate(ctx_cols, axis=-1)      # (T, E)

    # Output projection, fused in the same kernel.
    out = (jnp.dot(ctx, wo_ref[...], preferred_element_type=jnp.float32)
           + bo_ref[...])                         # (T, E)
    o_ref[0] = out


# ------------------------------ module wrapper -------------------------------


def init_params(key, emb_dim, qkv_bias=True):
    """Deterministic synthetic parameters, shapes matching the nn.Module."""
    ks = jax.random.split(key, 8)
    s = 1.0 / math.sqrt(emb_dim)

    def w(k):  # stored already transposed: (in, out)
        return jax.random.uniform(
            k, (emb_dim, emb_dim), jnp.float32, minval=-s, maxval=s
        )

    def b(k):
        return jax.random.uniform(k, (emb_dim,), jnp.float32, minval=-s, maxval=s)

    zeros = jnp.zeros((emb_dim,), jnp.float32)
    return {
        "wq_t": w(ks[0]), "bq": b(ks[1]) if qkv_bias else zeros,
        "wk_t": w(ks[2]), "bk": b(ks[3]) if qkv_bias else zeros,
        "wv_t": w(ks[4]), "bv": b(ks[5]) if qkv_bias else zeros,
        "wo_t": w(ks[6]), "bo": b(ks[7]),  # out_proj always has bias
    }


def multi_head_attn_forward(x, params, n_heads):
    """Pallas implementation of MultiHeadAttn.forward. x: (B, T, E) float32."""
    B, T, E = x.shape
    D = E // n_heads  # d_head
    scale = 1.0 / math.sqrt(float(n_heads))

    # Fuse Q/K/V weights into a single (E, 3E) projection.
    wqkv = jnp.concatenate(
        [params["wq_t"], params["wk_t"], params["wv_t"]], axis=1)       # (E, 3E)
    bqkv = jnp.concatenate(
        [params["bq"], params["bk"], params["bv"]]).reshape(1, 3 * E)   # (1, 3E)
    wo = params["wo_t"]                                                  # (E, E)
    bo = params["bo"].reshape(1, E)                                      # (1, E)

    kernel = functools.partial(
        _fused_mha_kernel, n_heads=n_heads, d_head=D, scale=scale)

    return pl.pallas_call(
        kernel,
        out_shape=jax.ShapeDtypeStruct((B, T, E), jnp.float32),
        grid=(B,),
        in_specs=[
            pl.BlockSpec((1, T, E), lambda b: (b, 0, 0)),     # x (lane-dense E)
            pl.BlockSpec((E, 3 * E), lambda b: (0, 0)),       # fused QKV weight
            pl.BlockSpec((1, 3 * E), lambda b: (0, 0)),       # fused QKV bias
            pl.BlockSpec((E, E), lambda b: (0, 0)),           # out_proj weight
            pl.BlockSpec((1, E), lambda b: (0, 0)),           # out_proj bias
        ],
        out_specs=pl.BlockSpec((1, T, E), lambda b: (b, 0, 0)),
        compiler_params=pltpu.CompilerParams(
            dimension_semantics=("parallel",),  # 2 batch blocks -> both v7x TCs
        ),
    )(x, wqkv, bqkv, wo, bo)


# ----------------------------- pure-JAX reference ----------------------------


def reference_forward(x, params, n_heads):
    B, T, E = x.shape
    D = E // n_heads
    q = x @ params["wq_t"] + params["bq"]
    k = x @ params["wk_t"] + params["bk"]
    v = x @ params["wv_t"] + params["bv"]

    def split(t):
        return t.reshape(B, T, D, n_heads).transpose(0, 2, 1, 3)  # (B, D, T, H)

    q, k, v = split(q), split(k), split(v)
    s = jnp.einsum("bdth,bdsh->bdts", q, k)
    mask = jnp.triu(jnp.ones((T, T), dtype=bool), k=1)
    s = jnp.where(mask, -jnp.inf, s)
    w = jax.nn.softmax(s / (n_heads ** 0.5), axis=-1)
    ctx = jnp.einsum("bdts,bdsh->bdth", w, v)
    ctx = ctx.transpose(0, 2, 1, 3).reshape(B, T, E)
    return ctx @ params["wo_t"] + params["bo"]


# ----------------------------------- main ------------------------------------

if __name__ == "__main__":
    cfg = {
        "emb_dim": 32,
        "n_heads": 4,
        "context_length": 8,
        "qkv_bias": True,
        "dropout_rate": 0.0,  # dropout is identity at inference
    }
    B, T, E = 2, cfg["context_length"], cfg["emb_dim"]

    key = jax.random.PRNGKey(0)
    kx, kp = jax.random.split(key)
    x = jax.random.normal(kx, (B, T, E), jnp.float32)
    params = init_params(kp, E, qkv_bias=cfg["qkv_bias"])

    fwd = jax.jit(functools.partial(multi_head_attn_forward,
                                    n_heads=cfg["n_heads"]))
    out = fwd(x, params)
    out = jax.block_until_ready(out)

    ref = reference_forward(x, params, cfg["n_heads"])
    # Everything is f32 except the EUP approximate reciprocal used for the
    # softmax normalization; tolerance is loosened (1e-5 -> 1e-2) only to
    # cover that approximation.
    np.testing.assert_allclose(np.asarray(out), np.asarray(ref),
                               atol=1e-2, rtol=1e-2)

    print("KERNEL_OK")
</pallas_src>

<mosaic_0001>
module attributes {stable_mosaic.version = 11 : i64} {
  func.func @_fused_mha_kernel(%arg0: i32, %arg1: memref<1x8x32xf32, #tpu.memory_space<vmem>>, %arg2: memref<32x96xf32, #tpu.memory_space<vmem>>, %arg3: memref<1x96xf32, #tpu.memory_space<vmem>>, %arg4: memref<32x32xf32, #tpu.memory_space<vmem>>, %arg5: memref<1x32xf32, #tpu.memory_space<vmem>>, %arg6: memref<1x8x32xf32, #tpu.memory_space<vmem>>) attributes {dimension_semantics = [#tpu.dimension_semantics<parallel>], iteration_bounds = array<i64: 2>, scalar_prefetch = 0 : i64, scratch_operands = 0 : i64, tpu.core_type = #tpu.core_type<tc>, window_params = [{transform_indices = @transform_0, window_bounds = array<i64: 1, 8, 32>}, {pipeline_mode = #tpu.pipeline_mode<synchronous>, transform_indices = @transform_1, window_bounds = array<i64: 32, 96>}, {pipeline_mode = #tpu.pipeline_mode<synchronous>, transform_indices = @transform_2, window_bounds = array<i64: 1, 96>}, {pipeline_mode = #tpu.pipeline_mode<synchronous>, transform_indices = @transform_3, window_bounds = array<i64: 32, 32>}, {pipeline_mode = #tpu.pipeline_mode<synchronous>, transform_indices = @transform_4, window_bounds = array<i64: 1, 32>}, {transform_indices = @transform_5, window_bounds = array<i64: 1, 8, 32>}]} {
    %c0 = arith.constant 0 : index
    %c0_0 = arith.constant 0 : index
    %c0_1 = arith.constant 0 : index
    %0 = vector.load %arg1[%c0, %c0_0, %c0_1] : memref<1x8x32xf32, #tpu.memory_space<vmem>>, vector<1x8x32xf32>
    %1 = vector.shape_cast %0 : vector<1x8x32xf32> to vector<8x32xf32>
    %c0_2 = arith.constant 0 : index
    %c0_3 = arith.constant 0 : index
    %2 = vector.load %arg2[%c0_2, %c0_3] : memref<32x96xf32, #tpu.memory_space<vmem>>, vector<32x96xf32>
    %cst = arith.constant dense<0.000000e+00> : vector<8x96xf32>
    %3 = tpu.matmul %1, %2, %cst {dimension_numbers = #tpu.dot_dimension_numbers<[1], [0], [0], [1], [0, 0, 1, 1], [], []>} : vector<8x32xf32>, vector<32x96xf32>, vector<8x96xf32> -> vector<8x96xf32>
    %c0_4 = arith.constant 0 : index
    %c0_5 = arith.constant 0 : index
    %4 = vector.load %arg3[%c0_4, %c0_5] : memref<1x96xf32, #tpu.memory_space<vmem>>, vector<1x96xf32>
    %5 = vector.broadcast %4 : vector<1x96xf32> to vector<8x96xf32>
    %6 = arith.addf %3, %5 : vector<8x96xf32>
    %7 = vector.extract_strided_slice %6 {offsets = [0, 0], sizes = [8, 32], strides = [1, 1]} : vector<8x96xf32> to vector<8x32xf32>
    %8 = vector.extract_strided_slice %6 {offsets = [0, 32], sizes = [8, 32], strides = [1, 1]} : vector<8x96xf32> to vector<8x32xf32>
    %9 = vector.extract_strided_slice %6 {offsets = [0, 64], sizes = [8, 32], strides = [1, 1]} : vector<8x96xf32> to vector<8x32xf32>
    %10 = tpu.iota {dimensions = array<i32: 0>} : vector<8x8xi32>
    %11 = tpu.iota {dimensions = array<i32: 1>} : vector<8x8xi32>
    %12 = arith.cmpi sgt, %11, %10 : vector<8x8xi32>
    %13 = vector.extract_strided_slice %7 {offsets = [0, 0], sizes = [8, 4], strides = [1, 1]} : vector<8x32xf32> to vector<8x4xf32>
    %14 = vector.extract_strided_slice %8 {offsets = [0, 0], sizes = [8, 4], strides = [1, 1]} : vector<8x32xf32> to vector<8x4xf32>
    %15 = vector.extract_strided_slice %9 {offsets = [0, 0], sizes = [8, 4], strides = [1, 1]} : vector<8x32xf32> to vector<8x4xf32>
    %cst_6 = arith.constant dense<0.000000e+00> : vector<8x8xf32>
    %16 = tpu.matmul %13, %14, %cst_6 {dimension_numbers = #tpu.dot_dimension_numbers<[1], [1], [0], [0], [0, 0, 1, 0], [], []>} : vector<8x4xf32>, vector<8x4xf32>, vector<8x8xf32> -> vector<8x8xf32>
    %cst_7 = arith.constant 5.000000e-01 : f32
    %17 = vector.broadcast %cst_7 : f32 to vector<8x8xf32>
    %18 = arith.mulf %16, %17 : vector<8x8xf32>
    %cst_8 = arith.constant 0xFF800000 : f32
    %19 = vector.broadcast %cst_8 : f32 to vector<8x8xf32>
    %20 = arith.select %12, %19, %18 : vector<8x8xi1>, vector<8x8xf32>
    %cst_9 = arith.constant dense<0xFF800000> : vector<8xf32>
    %21 = vector.multi_reduction <maximumf>, %20, %cst_9 [1] : vector<8x8xf32> to vector<8xf32>
    %22 = vector.shape_cast %21 : vector<8xf32> to vector<8x1xf32>
    %23 = vector.broadcast %22 : vector<8x1xf32> to vector<8x8xf32>
    %24 = arith.subf %20, %23 : vector<8x8xf32>
    %25 = math.exp %24 : vector<8x8xf32>
    %cst_10 = arith.constant dense<0.000000e+00> : vector<8xf32>
    %26 = vector.multi_reduction <add>, %25, %cst_10 [1] : vector<8x8xf32> to vector<8xf32>
    %27 = vector.shape_cast %26 : vector<8xf32> to vector<8x1xf32>
    %28 = tpu.reciprocal %27 {approx = true} : vector<8x1xf32> -> vector<8x1xf32>
    %29 = vector.broadcast %28 : vector<8x1xf32> to vector<8x8xf32>
    %30 = arith.mulf %25, %29 : vector<8x8xf32>
    %cst_11 = arith.constant dense<0.000000e+00> : vector<8x4xf32>
    %31 = tpu.matmul %30, %15, %cst_11 {dimension_numbers = #tpu.dot_dimension_numbers<[1], [0], [0], [1], [0, 0, 1, 1], [], []>} : vector<8x8xf32>, vector<8x4xf32>, vector<8x4xf32> -> vector<8x4xf32>
    %32 = vector.extract_strided_slice %7 {offsets = [0, 4], sizes = [8, 4], strides = [1, 1]} : vector<8x32xf32> to vector<8x4xf32>
    %33 = vector.extract_strided_slice %8 {offsets = [0, 4], sizes = [8, 4], strides = [1, 1]} : vector<8x32xf32> to vector<8x4xf32>
    %34 = vector.extract_strided_slice %9 {offsets = [0, 4], sizes = [8, 4], strides = [1, 1]} : vector<8x32xf32> to vector<8x4xf32>
    %cst_12 = arith.constant dense<0.000000e+00> : vector<8x8xf32>
    %35 = tpu.matmul %32, %33, %cst_12 {dimension_numbers = #tpu.dot_dimension_numbers<[1], [1], [0], [0], [0, 0, 1, 0], [], []>} : vector<8x4xf32>, vector<8x4xf32>, vector<8x8xf32> -> vector<8x8xf32>
    %cst_13 = arith.constant 5.000000e-01 : f32
    %36 = vector.broadcast %cst_13 : f32 to vector<8x8xf32>
    %37 = arith.mulf %35, %36 : vector<8x8xf32>
    %cst_14 = arith.constant 0xFF800000 : f32
    %38 = vector.broadcast %cst_14 : f32 to vector<8x8xf32>
    %39 = arith.select %12, %38, %37 : vector<8x8xi1>, vector<8x8xf32>
    %cst_15 = arith.constant dense<0xFF800000> : vector<8xf32>
    %40 = vector.multi_reduction <maximumf>, %39, %cst_15 [1] : vector<8x8xf32> to vector<8xf32>
    %41 = vector.shape_cast %40 : vector<8xf32> to vector<8x1xf32>
    %42 = vector.broadcast %41 : vector<8x1xf32> to vector<8x8xf32>
    %43 = arith.subf %39, %42 : vector<8x8xf32>
    %44 = math.exp %43 : vector<8x8xf32>
    %cst_16 = arith.constant dense<0.000000e+00> : vector<8xf32>
    %45 = vector.multi_reduction <add>, %44, %cst_16 [1] : vector<8x8xf32> to vector<8xf32>
    %46 = vector.shape_cast %45 : vector<8xf32> to vector<8x1xf32>
    %47 = tpu.reciprocal %46 {approx = true} : vector<8x1xf32> -> vector<8x1xf32>
    %48 = vector.broadcast %47 : vector<8x1xf32> to vector<8x8xf32>
    %49 = arith.mulf %44, %48 : vector<8x8xf32>
    %cst_17 = arith.constant dense<0.000000e+00> : vector<8x4xf32>
    %50 = tpu.matmul %49, %34, %cst_17 {dimension_numbers = #tpu.dot_dimension_numbers<[1], [0], [0], [1], [0, 0, 1, 1], [], []>} : vector<8x8xf32>, vector<8x4xf32>, vector<8x4xf32> -> vector<8x4xf32>
    %51 = vector.extract_strided_slice %7 {offsets = [0, 8], sizes = [8, 4], strides = [1, 1]} : vector<8x32xf32> to vector<8x4xf32>
    %52 = vector.extract_strided_slice %8 {offsets = [0, 8], sizes = [8, 4], strides = [1, 1]} : vector<8x32xf32> to vector<8x4xf32>
    %53 = vector.extract_strided_slice %9 {offsets = [0, 8], sizes = [8, 4], strides = [1, 1]} : vector<8x32xf32> to vector<8x4xf32>
    %cst_18 = arith.constant dense<0.000000e+00> : vector<8x8xf32>
    %54 = tpu.matmul %51, %52, %cst_18 {dimension_numbers = #tpu.dot_dimension_numbers<[1], [1], [0], [0], [0, 0, 1, 0], [], []>} : vector<8x4xf32>, vector<8x4xf32>, vector<8x8xf32> -> vector<8x8xf32>
    %cst_19 = arith.constant 5.000000e-01 : f32
    %55 = vector.broadcast %cst_19 : f32 to vector<8x8xf32>
    %56 = arith.mulf %54, %55 : vector<8x8xf32>
    %cst_20 = arith.constant 0xFF800000 : f32
    %57 = vector.broadcast %cst_20 : f32 to vector<8x8xf32>
    %58 = arith.select %12, %57, %56 : vector<8x8xi1>, vector<8x8xf32>
    %cst_21 = arith.constant dense<0xFF800000> : vector<8xf32>
    %59 = vector.multi_reduction <maximumf>, %58, %cst_21 [1] : vector<8x8xf32> to vector<8xf32>
    %60 = vector.shape_cast %59 : vector<8xf32> to vector<8x1xf32>
    %61 = vector.broadcast %60 : vector<8x1xf32> to vector<8x8xf32>
    %62 = arith.subf %58, %61 : vector<8x8xf32>
    %63 = math.exp %62 : vector<8x8xf32>
    %cst_22 = arith.constant dense<0.000000e+00> : vector<8xf32>
    %64 = vector.multi_reduction <add>, %63, %cst_22 [1] : vector<8x8xf32> to vector<8xf32>
    %65 = vector.shape_cast %64 : vector<8xf32> to vector<8x1xf32>
    %66 = tpu.reciprocal %65 {approx = true} : vector<8x1xf32> -> vector<8x1xf32>
    %67 = vector.broadcast %66 : vector<8x1xf32> to vector<8x8xf32>
    %68 = arith.mulf %63, %67 : vector<8x8xf32>
    %cst_23 = arith.constant dense<0.000000e+00> : vector<8x4xf32>
    %69 = tpu.matmul %68, %53, %cst_23 {dimension_numbers = #tpu.dot_dimension_numbers<[1], [0], [0], [1], [0, 0, 1, 1], [], []>} : vector<8x8xf32>, vector<8x4xf32>, vector<8x4xf32> -> vector<8x4xf32>
    %70 = vector.extract_strided_slice %7 {offsets = [0, 12], sizes = [8, 4], strides = [1, 1]} : vector<8x32xf32> to vector<8x4xf32>
    %71 = vector.extract_strided_slice %8 {offsets = [0, 12], sizes = [8, 4], strides = [1, 1]} : vector<8x32xf32> to vector<8x4xf32>
    %72 = vector.extract_strided_slice %9 {offsets = [0, 12], sizes = [8, 4], strides = [1, 1]} : vector<8x32xf32> to vector<8x4xf32>
    %cst_24 = arith.constant dense<0.000000e+00> : vector<8x8xf32>
    %73 = tpu.matmul %70, %71, %cst_24 {dimension_numbers = #tpu.dot_dimension_numbers<[1], [1], [0], [0], [0, 0, 1, 0], [], []>} : vector<8x4xf32>, vector<8x4xf32>, vector<8x8xf32> -> vector<8x8xf32>
    %cst_25 = arith.constant 5.000000e-01 : f32
    %74 = vector.broadcast %cst_25 : f32 to vector<8x8xf32>
    %75 = arith.mulf %73, %74 : vector<8x8xf32>
    %cst_26 = arith.constant 0xFF800000 : f32
    %76 = vector.broadcast %cst_26 : f32 to vector<8x8xf32>
    %77 = arith.select %12, %76, %75 : vector<8x8xi1>, vector<8x8xf32>
    %cst_27 = arith.constant dense<0xFF800000> : vector<8xf32>
    %78 = vector.multi_reduction <maximumf>, %77, %cst_27 [1] : vector<8x8xf32> to vector<8xf32>
    %79 = vector.shape_cast %78 : vector<8xf32> to vector<8x1xf32>
    %80 = vector.broadcast %79 : vector<8x1xf32> to vector<8x8xf32>
    %81 = arith.subf %77, %80 : vector<8x8xf32>
    %82 = math.exp %81 : vector<8x8xf32>
    %cst_28 = arith.constant dense<0.000000e+00> : vector<8xf32>
    %83 = vector.multi_reduction <add>, %82, %cst_28 [1] : vector<8x8xf32> to vector<8xf32>
    %84 = vector.shape_cast %83 : vector<8xf32> to vector<8x1xf32>
    %85 = tpu.reciprocal %84 {approx = true} : vector<8x1xf32> -> vector<8x1xf32>
    %86 = vector.broadcast %85 : vector<8x1xf32> to vector<8x8xf32>
    %87 = arith.mulf %82, %86 : vector<8x8xf32>
    %cst_29 = arith.constant dense<0.000000e+00> : vector<8x4xf32>
    %88 = tpu.matmul %87, %72, %cst_29 {dimension_numbers = #tpu.dot_dimension_numbers<[1], [0], [0], [1], [0, 0, 1, 1], [], []>} : vector<8x8xf32>, vector<8x4xf32>, vector<8x4xf32> -> vector<8x4xf32>
    %89 = vector.extract_strided_slice %7 {offsets = [0, 16], sizes = [8, 4], strides = [1, 1]} : vector<8x32xf32> to vector<8x4xf32>
    %90 = vector.extract_strided_slice %8 {offsets = [0, 16], sizes = [8, 4], strides = [1, 1]} : vector<8x32xf32> to vector<8x4xf32>
    %91 = vector.extract_strided_slice %9 {offsets = [0, 16], sizes = [8, 4], strides = [1, 1]} : vector<8x32xf32> to vector<8x4xf32>
    %cst_30 = arith.constant dense<0.000000e+00> : vector<8x8xf32>
    %92 = tpu.matmul %89, %90, %cst_30 {dimension_numbers = #tpu.dot_dimension_numbers<[1], [1], [0], [0], [0, 0, 1, 0], [], []>} : vector<8x4xf32>, vector<8x4xf32>, vector<8x8xf32> -> vector<8x8xf32>
    %cst_31 = arith.constant 5.000000e-01 : f32
    %93 = vector.broadcast %cst_31 : f32 to vector<8x8xf32>
    %94 = arith.mulf %92, %93 : vector<8x8xf32>
    %cst_32 = arith.constant 0xFF800000 : f32
    %95 = vector.broadcast %cst_32 : f32 to vector<8x8xf32>
    %96 = arith.select %12, %95, %94 : vector<8x8xi1>, vector<8x8xf32>
    %cst_33 = arith.constant dense<0xFF800000> : vector<8xf32>
    %97 = vector.multi_reduction <maximumf>, %96, %cst_33 [1] : vector<8x8xf32> to vector<8xf32>
    %98 = vector.shape_cast %97 : vector<8xf32> to vector<8x1xf32>
    %99 = vector.broadcast %98 : vector<8x1xf32> to vector<8x8xf32>
    %100 = arith.subf %96, %99 : vector<8x8xf32>
    %101 = math.exp %100 : vector<8x8xf32>
    %cst_34 = arith.constant dense<0.000000e+00> : vector<8xf32>
    %102 = vector.multi_reduction <add>, %101, %cst_34 [1] : vector<8x8xf32> to vector<8xf32>
    %103 = vector.shape_cast %102 : vector<8xf32> to vector<8x1xf32>
    %104 = tpu.reciprocal %103 {approx = true} : vector<8x1xf32> -> vector<8x1xf32>
    %105 = vector.broadcast %104 : vector<8x1xf32> to vector<8x8xf32>
    %106 = arith.mulf %101, %105 : vector<8x8xf32>
    %cst_35 = arith.constant dense<0.000000e+00> : vector<8x4xf32>
    %107 = tpu.matmul %106, %91, %cst_35 {dimension_numbers = #tpu.dot_dimension_numbers<[1], [0], [0], [1], [0, 0, 1, 1], [], []>} : vector<8x8xf32>, vector<8x4xf32>, vector<8x4xf32> -> vector<8x4xf32>
    %108 = vector.extract_strided_slice %7 {offsets = [0, 20], sizes = [8, 4], strides = [1, 1]} : vector<8x32xf32> to vector<8x4xf32>
    %109 = vector.extract_strided_slice %8 {offsets = [0, 20], sizes = [8, 4], strides = [1, 1]} : vector<8x32xf32> to vector<8x4xf32>
    %110 = vector.extract_strided_slice %9 {offsets = [0, 20], sizes = [8, 4], strides = [1, 1]} : vector<8x32xf32> to vector<8x4xf32>
    %cst_36 = arith.constant dense<0.000000e+00> : vector<8x8xf32>
    %111 = tpu.matmul %108, %109, %cst_36 {dimension_numbers = #tpu.dot_dimension_numbers<[1], [1], [0], [0], [0, 0, 1, 0], [], []>} : vector<8x4xf32>, vector<8x4xf32>, vector<8x8xf32> -> vector<8x8xf32>
    %cst_37 = arith.constant 5.000000e-01 : f32
    %112 = vector.broadcast %cst_37 : f32 to vector<8x8xf32>
    %113 = arith.mulf %111, %112 : vector<8x8xf32>
    %cst_38 = arith.constant 0xFF800000 : f32
    %114 = vector.broadcast %cst_38 : f32 to vector<8x8xf32>
    %115 = arith.select %12, %114, %113 : vector<8x8xi1>, vector<8x8xf32>
    %cst_39 = arith.constant dense<0xFF800000> : vector<8xf32>
    %116 = vector.multi_reduction <maximumf>, %115, %cst_39 [1] : vector<8x8xf32> to vector<8xf32>
    %117 = vector.shape_cast %116 : vector<8xf32> to vector<8x1xf32>
    %118 = vector.broadcast %117 : vector<8x1xf32> to vector<8x8xf32>
    %119 = arith.subf %115, %118 : vector<8x8xf32>
    %120 = math.exp %119 : vector<8x8xf32>
    %cst_40 = arith.constant dense<0.000000e+00> : vector<8xf32>
    %121 = vector.multi_reduction <add>, %120, %cst_40 [1] : vector<8x8xf32> to vector<8xf32>
    %122 = vector.shape_cast %121 : vector<8xf32> to vector<8x1xf32>
    %123 = tpu.reciprocal %122 {approx = true} : vector<8x1xf32> -> vector<8x1xf32>
    %124 = vector.broadcast %123 : vector<8x1xf32> to vector<8x8xf32>
    %125 = arith.mulf %120, %124 : vector<8x8xf32>
    %cst_41 = arith.constant dense<0.000000e+00> : vector<8x4xf32>
    %126 = tpu.matmul %125, %110, %cst_41 {dimension_numbers = #tpu.dot_dimension_numbers<[1], [0], [0], [1], [0, 0, 1, 1], [], []>} : vector<8x8xf32>, vector<8x4xf32>, vector<8x4xf32> -> vector<8x4xf32>
    %127 = vector.extract_strided_slice %7 {offsets = [0, 24], sizes = [8, 4], strides = [1, 1]} : vector<8x32xf32> to vector<8x4xf32>
    %128 = vector.extract_strided_slice %8 {offsets = [0, 24], sizes = [8, 4], strides = [1, 1]} : vector<8x32xf32> to vector<8x4xf32>
    %129 = vector.extract_strided_slice %9 {offsets = [0, 24], sizes = [8, 4], strides = [1, 1]} : vector<8x32xf32> to vector<8x4xf32>
    %cst_42 = arith.constant dense<0.000000e+00> : vector<8x8xf32>
    %130 = tpu.matmul %127, %128, %cst_42 {dimension_numbers = #tpu.dot_dimension_numbers<[1], [1], [0], [0], [0, 0, 1, 0], [], []>} : vector<8x4xf32>, vector<8x4xf32>, vector<8x8xf32> -> vector<8x8xf32>
    %cst_43 = arith.constant 5.000000e-01 : f32
    %131 = vector.broadcast %cst_43 : f32 to vector<8x8xf32>
    %132 = arith.mulf %130, %131 : vector<8x8xf32>
    %cst_44 = arith.constant 0xFF800000 : f32
    %133 = vector.broadcast %cst_44 : f32 to vector<8x8xf32>
    %134 = arith.select %12, %133, %132 : vector<8x8xi1>, vector<8x8xf32>
    %cst_45 = arith.constant dense<0xFF800000> : vector<8xf32>
    %135 = vector.multi_reduction <maximumf>, %134, %cst_45 [1] : vector<8x8xf32> to vector<8xf32>
    %136 = vector.shape_cast %135 : vector<8xf32> to vector<8x1xf32>
    %137 = vector.broadcast %136 : vector<8x1xf32> to vector<8x8xf32>
    %138 = arith.subf %134, %137 : vector<8x8xf32>
    %139 = math.exp %138 : vector<8x8xf32>
    %cst_46 = arith.constant dense<0.000000e+00> : vector<8xf32>
    %140 = vector.multi_reduction <add>, %139, %cst_46 [1] : vector<8x8xf32> to vector<8xf32>
    %141 = vector.shape_cast %140 : vector<8xf32> to vector<8x1xf32>
    %142 = tpu.reciprocal %141 {approx = true} : vector<8x1xf32> -> vector<8x1xf32>
    %143 = vector.broadcast %142 : vector<8x1xf32> to vector<8x8xf32>
    %144 = arith.mulf %139, %143 : vector<8x8xf32>
    %cst_47 = arith.constant dense<0.000000e+00> : vector<8x4xf32>
    %145 = tpu.matmul %144, %129, %cst_47 {dimension_numbers = #tpu.dot_dimension_numbers<[1], [0], [0], [1], [0, 0, 1, 1], [], []>} : vector<8x8xf32>, vector<8x4xf32>, vector<8x4xf32> -> vector<8x4xf32>
    %146 = vector.extract_strided_slice %7 {offsets = [0, 28], sizes = [8, 4], strides = [1, 1]} : vector<8x32xf32> to vector<8x4xf32>
    %147 = vector.extract_strided_slice %8 {offsets = [0, 28], sizes = [8, 4], strides = [1, 1]} : vector<8x32xf32> to vector<8x4xf32>
    %148 = vector.extract_strided_slice %9 {offsets = [0, 28], sizes = [8, 4], strides = [1, 1]} : vector<8x32xf32> to vector<8x4xf32>
    %cst_48 = arith.constant dense<0.000000e+00> : vector<8x8xf32>
    %149 = tpu.matmul %146, %147, %cst_48 {dimension_numbers = #tpu.dot_dimension_numbers<[1], [1], [0], [0], [0, 0, 1, 0], [], []>} : vector<8x4xf32>, vector<8x4xf32>, vector<8x8xf32> -> vector<8x8xf32>
    %cst_49 = arith.constant 5.000000e-01 : f32
    %150 = vector.broadcast %cst_49 : f32 to vector<8x8xf32>
    %151 = arith.mulf %149, %150 : vector<8x8xf32>
    %cst_50 = arith.constant 0xFF800000 : f32
    %152 = vector.broadcast %cst_50 : f32 to vector<8x8xf32>
    %153 = arith.select %12, %152, %151 : vector<8x8xi1>, vector<8x8xf32>
    %cst_51 = arith.constant dense<0xFF800000> : vector<8xf32>
    %154 = vector.multi_reduction <maximumf>, %153, %cst_51 [1] : vector<8x8xf32> to vector<8xf32>
    %155 = vector.shape_cast %154 : vector<8xf32> to vector<8x1xf32>
    %156 = vector.broadcast %155 : vector<8x1xf32> to vector<8x8xf32>
    %157 = arith.subf %153, %156 : vector<8x8xf32>
    %158 = math.exp %157 : vector<8x8xf32>
    %cst_52 = arith.constant dense<0.000000e+00> : vector<8xf32>
    %159 = vector.multi_reduction <add>, %158, %cst_52 [1] : vector<8x8xf32> to vector<8xf32>
    %160 = vector.shape_cast %159 : vector<8xf32> to vector<8x1xf32>
    %161 = tpu.reciprocal %160 {approx = true} : vector<8x1xf32> -> vector<8x1xf32>
    %162 = vector.broadcast %161 : vector<8x1xf32> to vector<8x8xf32>
    %163 = arith.mulf %158, %162 : vector<8x8xf32>
    %cst_53 = arith.constant dense<0.000000e+00> : vector<8x4xf32>
    %164 = tpu.matmul %163, %148, %cst_53 {dimension_numbers = #tpu.dot_dimension_numbers<[1], [0], [0], [1], [0, 0, 1, 1], [], []>} : vector<8x8xf32>, vector<8x4xf32>, vector<8x4xf32> -> vector<8x4xf32>
    %165 = tpu.concatenate %31, %50, %69, %88, %107, %126, %145, %164 in 1 : vector<8x4xf32>, vector<8x4xf32>, vector<8x4xf32>, vector<8x4xf32>, vector<8x4xf32>, vector<8x4xf32>, vector<8x4xf32>, vector<8x4xf32> -> vector<8x32xf32>
    %c0_54 = arith.constant 0 : index
    %c0_55 = arith.constant 0 : index
    %166 = vector.load %arg4[%c0_54, %c0_55] : memref<32x32xf32, #tpu.memory_space<vmem>>, vector<32x32xf32>
    %cst_56 = arith.constant dense<0.000000e+00> : vector<8x32xf32>
    %167 = tpu.matmul %165, %166, %cst_56 {dimension_numbers = #tpu.dot_dimension_numbers<[1], [0], [0], [1], [0, 0, 1, 1], [], []>} : vector<8x32xf32>, vector<32x32xf32>, vector<8x32xf32> -> vector<8x32xf32>
    %c0_57 = arith.constant 0 : index
    %c0_58 = arith.constant 0 : index
    %168 = vector.load %arg5[%c0_57, %c0_58] : memref<1x32xf32, #tpu.memory_space<vmem>>, vector<1x32xf32>
    %169 = vector.broadcast %168 : vector<1x32xf32> to vector<8x32xf32>
    %170 = arith.addf %167, %169 : vector<8x32xf32>
    %c0_59 = arith.constant 0 : index
    %c0_60 = arith.constant 0 : index
    %c0_61 = arith.constant 0 : index
    %171 = vector.load %arg6[%c0_59, %c0_60, %c0_61] : memref<1x8x32xf32, #tpu.memory_space<vmem>>, vector<1x8x32xf32>
    %172 = vector.shape_cast %171 : vector<1x8x32xf32> to vector<8x32xf32>
    %173 = vector.shape_cast %170 : vector<8x32xf32> to vector<1x8x32xf32>
    tpu.vector_store %arg6[%c0_59, %c0_60, %c0_61], %173 {strides = array<i32>} : memref<1x8x32xf32, #tpu.memory_space<vmem>>, vector<1x8x32xf32>,
    return
  }
  func.func @transform_0(%arg0: i32) -> (i32, i32, i32) {
    %c0_i32 = arith.constant 0 : i32
    %c0_i32_0 = arith.constant 0 : i32
    %c0_i32_1 = arith.constant 0 : i32
    return %arg0, %c0_i32, %c0_i32_0 : i32, i32, i32
  }
  func.func @transform_1(%arg0: i32) -> (i32, i32) {
    %c0_i32 = arith.constant 0 : i32
    %c0_i32_0 = arith.constant 0 : i32
    %c0_i32_1 = arith.constant 0 : i32
    return %c0_i32, %c0_i32_0 : i32, i32
  }
  func.func @transform_2(%arg0: i32) -> (i32, i32) {
    %c0_i32 = arith.constant 0 : i32
    %c0_i32_0 = arith.constant 0 : i32
    %c0_i32_1 = arith.constant 0 : i32
    return %c0_i32, %c0_i32_0 : i32, i32
  }
  func.func @transform_3(%arg0: i32) -> (i32, i32) {
    %c0_i32 = arith.constant 0 : i32
    %c0_i32_0 = arith.constant 0 : i32
    %c0_i32_1 = arith.constant 0 : i32
    return %c0_i32, %c0_i32_0 : i32, i32
  }
  func.func @transform_4(%arg0: i32) -> (i32, i32) {
    %c0_i32 = arith.constant 0 : i32
    %c0_i32_0 = arith.constant 0 : i32
    %c0_i32_1 = arith.constant 0 : i32
    return %c0_i32, %c0_i32_0 : i32, i32
  }
  func.func @transform_5(%arg0: i32) -> (i32, i32, i32) {
    %c0_i32 = arith.constant 0 : i32
    %c0_i32_0 = arith.constant 0 : i32
    %c0_i32_1 = arith.constant 0 : i32
    return %arg0, %c0_i32, %c0_i32_0 : i32, i32, i32
  }
}

</mosaic_0001>

<bundles_post_ra>
// kernel: multi_head_attn_forward.1
= control target key start
LH: loop header
LB: loop body
LE: loop exit
PB: predicated region body
PF: predicated region fallthrough
CT: control target
= control target key end

     0   :  { %10 = vsyncpa [#allocation3], 0  ;;  %s2582_s0 = inlined_call_operand.vmem [shape: f32[2,8,32], index: 0, kind: input, shape index: {}]   ;;  %s2583_s1 = inlined_call_operand.vmem [shape: f32[32,96], index: 1, kind: input, shape index: {}]   ;;  %s2584_s2 = inlined_call_operand.vmem [shape: f32[1,96], index: 2, kind: input, shape index: {}]   ;;  %s2585_s3 = inlined_call_operand.vmem [shape: f32[32,32], index: 3, kind: input, shape index: {}]   ;;  %s2586_s4 = inlined_call_operand.vmem [shape: f32[1,32], index: 4, kind: input, shape index: {}]   ;;  %s2587_s5 = inlined_call_operand.hbm [shape: f32[2,8,32], index: 5, kind: output, shape index: {}]  }
   0x1   :  { %12 = vsyncpa [#allocation3 + $0x1], 0  ;;  %s2272_s18 = smov 0   ;;  %s2274_s19 = smov 0  }
   0x2   :  { %s2276_s20 = smov 0   ;;  %s2278_s21 = smov 0  }
   0x3 LB: > { %s2293_s22 = sadd.s32 4294967295, %s2206_s21   ;;  %s1846_s23 = sadd.s32 4294967294, %s2206_s21   ;;  %s2206_s21 = sphi %s2278_s21, %s2595_s21   ;;  %s2202_s20 = sphi %s2276_s20, %s2594_s20   ;;  %s2198_s19 = sphi %s2274_s19, %s2593_s19   ;;  %s2194_s18 = sphi %s2272_s18, %s2592_s18  }
   0x4   : > { %s2297_s24 = sadd.s32 1, %s2206_s21   ;;  %s135_s25 = sadd.s32 1, %s2202_s20 }
   0x5   : > { %s132_s26 = ssub.s32 %s2206_s21, %s2297_s24  ;;  %p145_p0 = scmp.ne.s32.totalorder %s2202_s20, %s2198_s19 }
   0x6   : > { %p133_p1 = scmp.eq.s32.totalorder %s132_s26, 0  ;;  %p146_p2 = scmp.eq.s32.totalorder %s2293_s22, 1 }
   0x7   : > { %p151_p3 = scmp.ne.s32.totalorder %s2198_s19, %s2194_s18  ;;  %p152_p4 = scmp.eq.s32.totalorder %s1846_s23, 1 }
   0x8   : > { %s2308_s27 = scalar_select %p133_p1, %s2202_s20, %s135_s25  }
   0x9   : > { %p2310_p5 = por %p146_p2, %p145_p0  ;;  %p2314_p6 = por %p152_p4, %p151_p3 }
   0xa   : > { %p1849_p7 = scmp.ge.s32.totalorder %s2206_s21, 1  ;;  %p189_p8 = scmp.lt.s32.totalorder %s2206_s21, 3 }
   0xc   : > { %p190_p9 = pnand %p1849_p7, %p189_p8 }
   0xd   : > { %v221_v0 = vld [vmem:[%s2583_s1] sm:$0xff] (!%p190_p9)  ;;  %v222_v1 = vld [vmem:[%s2583_s1 + $0x8] sm:$0xff] (!%p190_p9)  ;;  %v223_v2 = vld [vmem:[%s2583_s1 + $0x10] sm:$0xff] (!%p190_p9)  ;;  %v2208_v3 = vmov (!%p190_p9), 0.0|0.0   ;;  %vm2209_vm0 = vmmov (!%p190_p9), 0   ;;  %v2210_v6 = vmov (!%p190_p9), 0.0   ;;  %v306_v19 = vlaneseq (!%p190_p9) }
   0xe   : > { %193 = sbr.rel (%p190_p9) target bundleno = 2016 (0x7e0), region = 40  ;;  %2028 = vmatprep.subr.bf16.mxu0 (!%p190_p9), %v2208_v3  ;;  %v2029_v4 = vpack.c.bf16 (!%p190_p9), %v222_v1, %v221_v0  ;;  %v224_v5 = vld [vmem:[%s2583_s1 + $0x18] sm:$0xff] (!%p190_p9)  ;;  %1934 = vmatprep.mubr.msk.f32.mxu0 (!%p190_p9), %vm2209_vm0, %v2210_v6  ;;  %p216_p10 = scmp.lt.s32.totalorder (!%p190_p9), %s2293_s22, 1  ;;  %vm232_vm1 = vcmask (!%p190_p9), 261120   ;;  %v1852_v9 = vld [vmem:[%s2584_s2] ss:$0 sm:$0xff] (!%p190_p9) }
   0xf   : > { %1937 = vmatprep.subr.mxu1 (!%p190_p9), %v2210_v6  ;;  %1939 = vmatprep.mubr.msk.f32.mxu1 (!%p190_p9), %vm2209_vm0, %v2210_v6  ;;  %v2032_v7 = vpack.c.bf16 (!%p190_p9), %v224_v5, %v223_v2  ;;  %s2211_s26 = smov (!%p190_p9), 64   ;;  %s2212_s30 = smov (!%p190_p9), 96   ;;  %vm314_vm2 = vcmask (!%p190_p9), 31744   ;;  %v307_v20 = vshrl.u32 (!%p190_p9), %v306_v19, 7  ;;  %v309_v21 = vand.u32 (!%p190_p9), 127, %v306_v19 }
  0x10   : > { %2030 = vmatpush3.bf16.msra.mxu0 (!%p190_p9), %v2029_v4  ;;  %s2213_s6 = smov (!%p190_p9), 92   ;;  %s2214_s7 = smov (!%p190_p9), 124   ;;  %vm391_vm4 = vcmask (!%p190_p9), 64512   ;;  %vm1678_vm5 = vcmask (!%p190_p9), 97280   ;;  %vm1680_vm6 = vcmask (!%p190_p9), 130048   ;;  %vm1682_vm7 = vcmask (!%p190_p9), 162816  }
  0x11   : > { %2031 = vmatprep.subr.bf16.mxu0 (!%p190_p9), %v2208_v3  ;;  %s2215_s8 = smov (!%p190_p9), 88   ;;  %s2216_s9 = smov (!%p190_p9), 120   ;;  %vm2376_vm3 = vcmp.gt.s32.totalorder (!%p190_p9), %v309_v21, %v307_v20  ;;  %vm1684_vm8 = vcmask (!%p190_p9), 195584   ;;  %vm1686_vm9 = vcmask (!%p190_p9), 228352  }
  0x12   : > { %s2217_s10 = smov (!%p190_p9), 116   ;;  %s2218_s11 = smov (!%p190_p9), 84  }
  0x13   : > { %s2219_s12 = smov (!%p190_p9), 72   ;;  %s2222_s15 = smov (!%p190_p9), 112  }
  0x14   : > { %2033 = vmatpush3.bf16.msra.mxu0 (!%p190_p9), %v2032_v7  ;;  %s2223_s16 = smov (!%p190_p9), 76   ;;  %s2225_s23 = smov (!%p190_p9), 104  }
  0x15   : > { %s217_s13 = scalar_select %p216_p10, %s2293_s22, 1  ;;  %1957 = vmatprep.subr.mxu0 %v2210_v6 }
  0x16   : > { %s2226_s25 = smov 100  }
  0x17   : > { %s1851_s14 = sshll.u32 %s217_s13, 3  ;;  %s2220_s13 = smov 68  }
  0x18   : > { %s219_s17 = scalar_lea.vmem %s2582_s0, %s1851_s14  ;;  %s2221_s14 = smov 80  }
  0x19   : > { %v220_v8 = vld [vmem:[%s219_s17] sm:$0xff]  ;;  %s2224_s17 = smov 108  }
  0x1a   : > { %1935 = vmatmul.mubr.msk.f32.vlgmr.msra.gmra.mrb[0].mxu0 %vm232_vm1, %v220_v8 }
  0x1b   : > { %1959 = vmatprep.mubr.msk.f32.mxu0 %vm2209_vm0, %v2210_v6 }
  0xed   : > { %v302_v10 = vpop.f32.mrb[0].mxu0 }
  0xee   : > { %v2351_v11 = vadd.f32 %v1852_v9, %v302_v10  ;;  %v1936_v12 = vpop.f32.mrb[1].mxu0 }
  0xf0   : > { %403 = vrot.lane.b32.xlu1 %v2351_v11, %s2211_s26  ;;  %312 = vrot.lane.b32.xlu0 %v2351_v11, %s2212_s30  ;;  %s2227_s26 = smov 60   ;;  %s2228_s30 = smov 52  }
  0xf4   : > { %481 = vrot.lane.b32.xlu1 %v2351_v11, %s2213_s6  ;;  %s2229_s6 = smov 48  }
  0xf8   : > { %479 = vrot.lane.b32.xlu1 %v2351_v11, %s2214_s7  ;;  %s2230_s7 = smov 56  }
  0xfc   : > { %648 = vrot.lane.b32.xlu1 %v2351_v11, %s2215_s8  ;;  %s2231_s8 = smov 40  }
 0x100   : > { %646 = vrot.lane.b32.xlu1 %v2351_v11, %s2216_s9  ;;  %s2232_s9 = smov 44  }
 0x104   : > { %813 = vrot.lane.b32.xlu1 %v2351_v11, %s2217_s10  ;;  %s2233_s10 = smov 36  }
 0x162   : > { %v404_v13 = vpop.permute.xlu1 %403  ;;  %v313_v14 = vpop.permute.xlu0 %312 }
 0x163   : > { %1938 = vmatpush3.xpose.msk.msra.mxu1 %vm314_vm2, %v313_v14 }
 0x164   : > { %1942 = vmatprep.subr.mxu1 %v2210_v6 }
 0x166   : > { %v2362_v15 = vpop.permute.xlu1 %481  ;;  %1940 = vmatmul.mubr.msk.f32.vlgmr.msra.gmra.mrb[0].mxu1 %vm314_vm2, %v2351_v11 }
 0x167   : > { %1943 = vmatpush3.msra.mxu1 %v404_v13  ;;  %1944 = vmatprep.mubr.msk.f32.mxu1 %vm2209_vm0, %v2210_v6 }
 0x168   : > { %1947 = vmatprep.subr.mxu1 %v2210_v6 }
 0x16a   : > { %v2369_v16 = vpop.permute.xlu1 %479 }
 0x16e   : > { %v649_v17 = vpop.permute.xlu1 %648 }
 0x16f   : > { %1958 = vmatpush3.xpose.msk.msra.mxu0 %vm314_vm2, %v649_v17 }
 0x170   : > { %1967 = vmatprep.subr.mxu0 %v2210_v6 }
 0x172   : > { %v647_v18 = vpop.permute.xlu1 %646 }
 0x173   : > { %1960 = vmatmul.mubr.msk.f32.vlgmr.msra.gmra.mrb[2].mxu0 %vm314_vm2, %v647_v18 }
 0x174   : > { %1969 = vmatprep.mubr.msk.f32.mxu0 %vm2209_vm0, %v2210_v6 }
 0x176   : > { %v814_v34 = vpop.permute.xlu1 %813 }
 0x239   : > { %v385_v22 = vpop.f32.mrb[0].mxu1 }
 0x23a   : > { %v389_v24 = vmul.f32 0.5, %v385_v22  ;;  %v1941_v25 = vpop.f32.mrb[1].mxu1 }
 0x23c   : > { %v390_v26 = vsel %vm2376_vm3, -inf, %v389_v24 }
 0x23d   : > { %v392_v27 = vsel %vm391_vm4, %v390_v26, -inf }
 0x23e   : > { %393 = vmax.xlane.f32.xlu0 %v392_v27 }
 0x246   : > { %v720_v28 = vpop.f32.mrb[2].mxu0 }
 0x247   : > { %v1961_v29 = vpop.f32.mrb[3].mxu0  ;;  %v724_v37 = vmul.f32 0.5, %v720_v28 }
 0x249   : > { %v725_v38 = vsel %vm2376_vm3, -inf, %v724_v37 }
 0x24a   : > { %v726_v39 = vsel %vm391_vm4, %v725_v38, -inf }
 0x254   : > { %815 = vrot.lane.b32.xlu0 %v2351_v11, %s2218_s11  ;;  %s2234_s11 = smov 4  }
 0x258   : > { %1316 = vrot.lane.b32.xlu0 %v2351_v11, %s2219_s12 }
 0x25c   : > { %1483 = vrot.lane.b32.xlu0 %v2351_v11, %s2220_s13 }
 0x2cb   : > { %v394_v30 = vpop.xlane.xlu0 %393 }
 0x2cc   : > { %v395_v31 = vsub.f32 %v390_v26, %v394_v30 }
 0x2ce   : > { %v396_v32 = vmul.f32 1.442695, %v395_v31 }
 0x2cf   : > { %v816_v33 = vpop.permute.xlu0 %815 }
 0x2d0   : > { %2112 = vpow2.f32 %v396_v32  ;;  %1968 = vmatpush3.xpose.msk.msra.mxu0 %vm314_vm2, %v816_v33 }
 0x2d1   : > { %1977 = vmatprep.subr.mxu0 %v2210_v6 }
 0x2d3   : > { %1970 = vmatmul.mubr.msk.f32.vlgmr.msra.gmra.mrb[4].mxu0 %vm314_vm2, %v814_v34  ;;  %v1317_v46 = vpop.permute.xlu0 %1316 }
 0x2d4   : > { %1979 = vmatprep.mubr.msk.f32.mxu0 %vm2209_vm0, %v2210_v6 }
 0x2d7   : > { %v1484_v49 = vpop.permute.xlu0 %1483 }
 0x2da   : > { %v2113_v35 = vpop.eup %2112 }
 0x2db   : > { %v398_v36 = vsel %vm391_vm4, %v2113_v35, 0.0 }
 0x2dc   : > { %399 = vadd.xlane.f32.xlu1 %v398_v36 }
 0x2ed   : > { %982 = vrot.lane.b32.xlu1 %v2351_v11, %s2221_s14  ;;  %s1881_s14 = sshll.u32 %s2293_s22, 7  ;;  %s2241_s22 = smov [#allocation2]  }
 0x2f1   : > { %980 = vrot.lane.b32.xlu1 %v2351_v11, %s2222_s15 }
 0x2f5   : > { %1149 = vrot.lane.b32.xlu1 %v2351_v11, %s2223_s16  ;;  %s2235_s16 = smov 8  }
 0x2f9   : > { %1147 = vrot.lane.b32.xlu1 %v2351_v11, %s2224_s17 }
 0x2fd   : > { %1314 = vrot.lane.b32.xlu1 %v2351_v11, %s2225_s23 }
 0x301   : > { %1481 = vrot.lane.b32.xlu1 %v2351_v11, %s2226_s25  ;;  %s2539_s25 = scalar_lea.hbm %s2587_s5, %s1881_s14 }
 0x325   : > { %727 = vmax.xlane.f32.xlu1 %v726_v39 }
 0x369   : > { %v400_v40 = vpop.xlane.xlu1 %399 }
 0x36a   : > { %2114 = vrcp.f32 %v400_v40 }
 0x36d   : > { %v983_v41 = vpop.permute.xlu1 %982 }
 0x36e   : > { %1978 = vmatpush3.xpose.msk.msra.mxu0 %vm314_vm2, %v983_v41 }
 0x36f   : > { %1987 = vmatprep.subr.mxu0 %v2210_v6 }
 0x371   : > { %v981_v42 = vpop.permute.xlu1 %980 }
 0x372   : > { %1980 = vmatmul.mubr.msk.f32.vlgmr.msra.gmra.mrb[6].mxu0 %vm314_vm2, %v981_v42 }
 0x373   : > { %1989 = vmatprep.mubr.msk.f32.mxu0 %vm2209_vm0, %v2210_v6 }
 0x374   : > { %v2115_v43 = vpop.eup %2114 }
 0x375   : > { %v402_v44 = vmul.f32 %v2115_v43, %v2113_v35  ;;  %v1150_v45 = vpop.permute.xlu1 %1149 }
 0x376   : > { %1988 = vmatpush3.xpose.msk.msra.mxu0 %vm314_vm2, %v1150_v45 }
 0x377   : > { %1945 = vmatmul.mubr.msk.f32.vlgmr.msra.gmra.mrb[2].mxu1 %vm391_vm4, %v402_v44  ;;  %1997 = vmatprep.subr.mxu0 %v2210_v6 }
 0x378   : > { %1948 = vmatpush3.xpose.msk.msra.mxu1 %vm314_vm2, %v2362_v15  ;;  %1949 = vmatprep.mubr.msk.f32.mxu1 %vm2209_vm0, %v2210_v6 }
 0x379   : > { %v1148_v47 = vpop.permute.xlu1 %1147  ;;  %1952 = vmatprep.subr.mxu1 %v2210_v6 }
 0x37a   : > { %1990 = vmatmul.mubr.msk.f32.vlgmr.msra.gmra.mrb[8].mxu0 %vm314_vm2, %v1148_v47 }
 0x37b   : > { %1998 = vmatpush3.xpose.msk.msra.mxu0 %vm314_vm2, %v1317_v46  ;;  %1950 = vmatmul.mubr.msk.f32.vlgmr.msra.gmra.mrb[4].mxu1 %vm314_vm2, %v2369_v16 }
 0x37c   : > { %1999 = vmatprep.mubr.msk.f32.mxu0 %vm2209_vm0, %v2210_v6  ;;  %2007 = vmatprep.subr.mxu0 %v2210_v6 }
 0x37d   : > { %v1315_v48 = vpop.permute.xlu1 %1314  ;;  %1954 = vmatprep.mubr.msk.f32.mxu1 %vm2209_vm0, %v2210_v6 }
 0x37e   : > { %2000 = vmatmul.mubr.msk.f32.vlgmr.msra.gmra.mrb[10].mxu0 %vm314_vm2, %v1315_v48 }
 0x37f   : > { %2008 = vmatpush3.xpose.msk.msra.mxu0 %vm314_vm2, %v1484_v49  ;;  %2009 = vmatprep.mubr.msk.f32.mxu0 %vm2209_vm0, %v2210_v6 }
 0x380   : > { %2034 = vmatprep.subr.bf16.mxu0 %v2208_v3 }
 0x381   : > { %v1482_v50 = vpop.permute.xlu1 %1481 }
 0x382   : > { %2010 = vmatmul.mubr.msk.f32.vlgmr.msra.gmra.mrb[12].mxu0 %vm314_vm2, %v1482_v50 }
 0x383   : > { %2025 = vmatprep.mubr.msk.f32.mxu0 %vm2209_vm0, %v2210_v6 }
 0x3a6   : > { %v887_v51 = vpop.f32.mrb[4].mxu0 }
 0x3a7   : > { %v1971_v52 = vpop.f32.mrb[5].mxu0  ;;  %v891_v0 = vmul.f32 0.5, %v887_v51 }
 0x3a9   : > { %v892_v13 = vsel %vm2376_vm3, -inf, %v891_v0 }
 0x3aa   : > { %v893_v17 = vsel %vm391_vm4, %v892_v13, -inf }
 0x3b2   : > { %v728_v53 = vpop.xlane.xlu1 %727 }
 0x3b3   : > { %v729_v56 = vsub.f32 %v725_v38, %v728_v53 }
 0x3b5   : > { %v730_v59 = vmul.f32 1.442695, %v729_v56 }
 0x3b7   : > { %2116 = vpow2.f32 %v730_v59 }
 0x3c1   : > { %v2447_v22 = vpop.eup %2116 }
 0x3c2   : > { %v732_v26 = vsel %vm391_vm4, %v2447_v22, 0.0 }
 0x445   : > { %v1054_v54 = vpop.f32.mrb[6].mxu0 }
 0x446   : > { %v1981_v55 = vpop.f32.mrb[7].mxu0  ;;  %v1058_v12 = vmul.f32 0.5, %v1054_v54 }
 0x448   : > { %v1059_v19 = vsel %vm2376_vm3, -inf, %v1058_v12 }
 0x449   : > { %v1060_v24 = vsel %vm391_vm4, %v1059_v19, -inf }
 0x44a   : > { %v2431_v57 = vpop.f32.mrb[2].mxu1 }
 0x44b   : > { %v1946_v58 = vpop.f32.mrb[3].mxu1 }
 0x44d   : > { %v1221_v60 = vpop.f32.mrb[8].mxu0 }
 0x44e   : > { %v1225_v61 = vmul.f32 0.5, %v1221_v60  ;;  %v553_v62 = vpop.f32.mrb[4].mxu1  ;;  %v1991_v63 = vpop.f32.mrb[9].mxu0 }
 0x44f   : > { %v557_v1 = vmul.f32 0.5, %v553_v62  ;;  %v1951_v2 = vpop.f32.mrb[5].mxu1 }
 0x450   : > { %v1226_v4 = vsel %vm2376_vm3, -inf, %v1225_v61 }
 0x451   : > { %v1388_v5 = vpop.f32.mrb[10].mxu0  ;;  %v1227_v7 = vsel %vm391_vm4, %v1226_v4, -inf  ;;  %v558_v8 = vsel %vm2376_vm3, -inf, %v557_v1 }
 0x452   : > { %1228 = vmax.xlane.f32.xlu1 %v1227_v7  ;;  %v2001_v9 = vpop.f32.mrb[11].mxu0  ;;  %v559_v10 = vsel %vm391_vm4, %v558_v8, -inf  ;;  %v1392_v18 = vmul.f32 0.5, %v1388_v5 }
 0x453   : > { %560 = vmax.xlane.f32.xlu0 %v559_v10 }
 0x454   : > { %v1393_v25 = vsel %vm2376_vm3, -inf, %v1392_v18 }
 0x455   : > { %v1555_v14 = vpop.f32.mrb[12].mxu0  ;;  %v1394_v27 = vsel %vm391_vm4, %v1393_v25, -inf }
 0x456   : > { %v1559_v15 = vmul.f32 0.5, %v1555_v14  ;;  %v2011_v16 = vpop.f32.mrb[13].mxu0 }
 0x457   : > { %894 = vmax.xlane.f32.xlu0 %v893_v17 }
 0x458   : > { %v1560_v20 = vsel %vm2376_vm3, -inf, %v1559_v15 }
 0x459   : > { %v1561_v21 = vsel %vm391_vm4, %v1560_v20, -inf }
 0x45a   : > { %1562 = vmax.xlane.f32.xlu1 %v1561_v21 }
 0x45b   : > { %1061 = vmax.xlane.f32.xlu0 %v1060_v24 }
 0x45e   : > { %733 = vadd.xlane.f32.xlu1 %v732_v26 }
 0x45f   : > { %1395 = vmax.xlane.f32.xlu0 %v1394_v27 }
 0x4df   : > { %v1229_v28 = vpop.xlane.xlu1 %1228 }
 0x4e0   : > { %v561_v29 = vpop.xlane.xlu0 %560  ;;  %v1230_v30 = vsub.f32 %v1226_v4, %v1229_v28  ;;  %v1688_v28 = vld [vmem:[%s2585_s3] sm:$0xff] }
 0x4e1   : > { %v562_v38 = vsub.f32 %v558_v8, %v561_v29  ;;  %v1689_v29 = vld [vmem:[%s2585_s3 + $0x8] sm:$0xff] }
 0x4e2   : > { %v1231_v33 = vmul.f32 1.442695, %v1230_v30  ;;  %v2035_v30 = vpack.c.bf16 %v1689_v29, %v1688_v28 }
 0x4e3   : > { %v563_v43 = vmul.f32 1.442695, %v562_v38 }
 0x4e4   : > { %v895_v31 = vpop.xlane.xlu0 %894  ;;  %2036 = vmatpush3.bf16.msra.mxu0 %v2035_v30 }
 0x4e5   : > { %v896_v32 = vsub.f32 %v892_v13, %v895_v31  ;;  %2037 = vmatprep.subr.bf16.mxu0 %v2208_v3 }
 0x4e7   : > { %v897_v34 = vmul.f32 1.442695, %v896_v32  ;;  %v1563_v35 = vpop.xlane.xlu1 %1562  ;;  %v1690_v32 = vld [vmem:[%s2585_s3 + $0x10] sm:$0xff] }
 0x4e8   : > { %v1564_v36 = vsub.f32 %v1560_v20, %v1563_v35  ;;  %v1062_v37 = vpop.xlane.xlu0 %1061 }
 0x4e9   : > { %2118 = vpow2.f32 %v897_v34  ;;  %v1063_v23 = vsub.f32 %v1059_v19, %v1062_v37 }
 0x4ea   : > { %2120 = vpow2.f32 %v1231_v33  ;;  %v1565_v39 = vmul.f32 1.442695, %v1564_v36  ;;  %v1691_v33 = vld [vmem:[%s2585_s3 + $0x18] sm:$0xff] }
 0x4eb   : > { %v1064_v40 = vmul.f32 1.442695, %v1063_v23  ;;  %v734_v58 = vpop.xlane.xlu1 %733  ;;  %v2038_v35 = vpack.c.bf16 %v1691_v33, %v1690_v32 }
 0x4ec   : > { %v1396_v41 = vpop.xlane.xlu0 %1395 }
 0x4ed   : > { %2122 = vpow2.f32 %v1064_v40  ;;  %v1397_v42 = vsub.f32 %v1393_v25, %v1396_v41  ;;  %2039 = vmatpush3.bf16.msra.mxu0 %v2038_v35 }
 0x4ee   : > { %2124 = vpow2.f32 %v1565_v39 }
 0x4ef   : > { %v1398_v44 = vmul.f32 1.442695, %v1397_v42 }
 0x4f1   : > { %2126 = vpow2.f32 %v1398_v44 }
 0x4f2   : > { %2128 = vpow2.f32 %v563_v43 }
 0x4f3   : > { %v2455_v45 = vpop.eup %2118 }
 0x4f4   : > { %v899_v46 = vsel %vm391_vm4, %v2455_v45, 0.0  ;;  %v2459_v47 = vpop.eup %2120 }
 0x4f5   : > { %900 = vadd.xlane.f32.xlu0 %v899_v46  ;;  %v1233_v49 = vsel %vm391_vm4, %v2459_v47, 0.0 }
 0x4f7   : > { %v2461_v48 = vpop.eup %2122 }
 0x4f8   : > { %v1066_v50 = vsel %vm391_vm4, %v2461_v48, 0.0  ;;  %v2467_v51 = vpop.eup %2124 }
 0x4f9   : > { %1234 = vadd.xlane.f32.xlu0 %v1233_v49  ;;  %1067 = vadd.xlane.f32.xlu1 %v1066_v50  ;;  %v1567_v54 = vsel %vm391_vm4, %v2467_v51, 0.0 }
 0x4fb   : > { %v2469_v52 = vpop.eup %2126 }
 0x4fc   : > { %v1400_v53 = vsel %vm391_vm4, %v2469_v52, 0.0  ;;  %v2129_v55 = vpop.eup %2128 }
 0x4fd   : > { %1401 = vadd.xlane.f32.xlu1 %v1400_v53  ;;  %1568 = vadd.xlane.f32.xlu0 %v1567_v54  ;;  %v565_v56 = vsel %vm391_vm4, %v2129_v55, 0.0 }
 0x501   : > { %566 = vadd.xlane.f32.xlu0 %v565_v56 }
 0x50e   : > { %570 = vrot.lane.b32.xlu1 %v2351_v11, %s2227_s26 }
 0x512   : > { %904 = vrot.lane.b32.xlu1 %v2351_v11, %s2228_s30  ;;  %s2236_s30 = smov 12  }
 0x516   : > { %1071 = vrot.lane.b32.xlu1 %v2351_v11, %s2229_s6  ;;  %s2237_s6 = smov 16  }
 0x517   : > { %737 = vrot.lane.b32.xlu0 %v2351_v11, %s2230_s7  ;;  %s2238_s7 = smov 20  }
 0x51a   : > { %1405 = vrot.lane.b32.xlu1 %v2351_v11, %s2231_s8  ;;  %s2239_s8 = smov 24  }
 0x51b   : > { %1238 = vrot.lane.b32.xlu0 %v2351_v11, %s2232_s9  ;;  %s2240_s9 = smov 28  }
 0x51f   : > { %1572 = vrot.lane.b32.xlu0 %v2351_v11, %s2233_s10  ;;  %s213_s10 = sand.u32 1, %s2198_s19  }
 0x520   : > { %s1774_s26 = scalar_lea.sflag [#allocation3], %s213_s10 }
 0x582   : > { %v901_v59 = vpop.xlane.xlu0 %900 }
 0x586   : > { %v1235_v60 = vpop.xlane.xlu0 %1234  ;;  %v1068_v61 = vpop.xlane.xlu1 %1067 }
 0x58a   : > { %v1569_v62 = vpop.xlane.xlu0 %1568  ;;  %v1402_v63 = vpop.xlane.xlu1 %1401 }
 0x58e   : > { %v567_v0 = vpop.xlane.xlu0 %566  ;;  %v571_v1 = vpop.permute.xlu1 %570 }
 0x58f   : > { %2130 = vrcp.f32 %v567_v0  ;;  %1953 = vmatpush3.msra.mxu1 %v571_v1 }
 0x590   : > { %1962 = vmatprep.subr.mxu1 %v2210_v6  ;;  %2132 = vrcp.f32 %v734_v58 }
 0x591   : > { %2134 = vrcp.f32 %v901_v59 }
 0x592   : > { %2136 = vrcp.f32 %v1068_v61  ;;  %v738_v7 = vpop.permute.xlu0 %737  ;;  %v905_v8 = vpop.permute.xlu1 %904 }
 0x593   : > { %2138 = vrcp.f32 %v1235_v60 }
 0x594   : > { %2140 = vrcp.f32 %v1402_v63 }
 0x595   : > { %2142 = vrcp.f32 %v1569_v62 }
 0x596   : > { %v1072_v13 = vpop.permute.xlu1 %1071  ;;  %v1239_v16 = vpop.permute.xlu0 %1238 }
 0x599   : > { %v2131_v2 = vpop.eup %2130 }
 0x59a   : > { %v569_v4 = vmul.f32 %v2131_v2, %v2129_v55  ;;  %v2133_v5 = vpop.eup %2132  ;;  %v1406_v19 = vpop.permute.xlu1 %1405 }
 0x59b   : > { %v736_v11 = vmul.f32 %v2133_v5, %v2447_v22  ;;  %v2135_v9 = vpop.eup %2134  ;;  %v1573_v22 = vpop.permute.xlu0 %1572 }
 0x59c   : > { %1955 = vmatmul.mubr.msk.f32.vlgmr.msra.gmra.mrb[6].mxu1 %vm391_vm4, %v569_v4  ;;  %v903_v10 = vmul.f32 %v2135_v9, %v2455_v45  ;;  %v2137_v12 = vpop.eup %2136 }
 0x59d   : > { %1963 = vmatpush3.msra.mxu1 %v738_v7  ;;  %1964 = vmatprep.mubr.msk.f32.mxu1 %vm2209_vm0, %v2210_v6  ;;  %v1070_v14 = vmul.f32 %v2137_v12, %v2461_v48  ;;  %v2139_v15 = vpop.eup %2138 }
 0x59e   : > { %1972 = vmatprep.subr.mxu1 %v2210_v6  ;;  %v1237_v17 = vmul.f32 %v2139_v15, %v2459_v47  ;;  %v2141_v18 = vpop.eup %2140 }
 0x59f   : > { %v1404_v20 = vmul.f32 %v2141_v18, %v2469_v52  ;;  %v2143_v21 = vpop.eup %2142 }
 0x5a0   : > { %1965 = vmatmul.mubr.msk.f32.vlgmr.msra.gmra.mrb[8].mxu1 %vm391_vm4, %v736_v11  ;;  %v1571_v24 = vmul.f32 %v2143_v21, %v2467_v51 }
 0x5a1   : > { %1973 = vmatpush3.msra.mxu1 %v905_v8  ;;  %1974 = vmatprep.mubr.msk.f32.mxu1 %vm2209_vm0, %v2210_v6 }
 0x5a2   : > { %1982 = vmatprep.subr.mxu1 %v2210_v6 }
 0x5a4   : > { %1975 = vmatmul.mubr.msk.f32.vlgmr.msra.gmra.mrb[10].mxu1 %vm391_vm4, %v903_v10 }
 0x5a5   : > { %1983 = vmatpush3.msra.mxu1 %v1072_v13  ;;  %1984 = vmatprep.mubr.msk.f32.mxu1 %vm2209_vm0, %v2210_v6 }
 0x5a6   : > { %1992 = vmatprep.subr.mxu1 %v2210_v6 }
 0x5a8   : > { %1985 = vmatmul.mubr.msk.f32.vlgmr.msra.gmra.mrb[12].mxu1 %vm391_vm4, %v1070_v14 }
 0x5a9   : > { %1993 = vmatpush3.msra.mxu1 %v1239_v16  ;;  %1994 = vmatprep.mubr.msk.f32.mxu1 %vm2209_vm0, %v2210_v6 }
 0x5aa   : > { %2002 = vmatprep.subr.mxu1 %v2210_v6 }
 0x5ac   : > { %1995 = vmatmul.mubr.msk.f32.vlgmr.msra.gmra.mrb[14].mxu1 %vm391_vm4, %v1237_v17 }
 0x5ad   : > { %2003 = vmatpush3.msra.mxu1 %v1406_v19  ;;  %2004 = vmatprep.mubr.msk.f32.mxu1 %vm2209_vm0, %v2210_v6 }
 0x5ae   : > { %2012 = vmatprep.subr.mxu1 %v2210_v6 }
 0x5b0   : > { %2005 = vmatmul.mubr.msk.f32.vlgmr.msra.gmra.mrb[16].mxu1 %vm391_vm4, %v1404_v20 }
 0x5b1   : > { %2013 = vmatpush3.msra.mxu1 %v1573_v22  ;;  %2014 = vmatprep.mubr.msk.f32.mxu1 %vm2209_vm0, %v2210_v6 }
 0x5b4   : > { %2015 = vmatmul.mubr.msk.f32.vlgmr.msra.gmra.mrb[18].mxu1 %vm391_vm4, %v1571_v24 }
 0x66f   : > { %v642_v25 = vpop.f32.mrb[6].mxu1 }
 0x670   : > { %1649 = vrot.lane.b32.xlu1 %v642_v25, %s2234_s11  ;;  %v1956_v26 = vpop.f32.mrb[7].mxu1  ;;  %s1850_s11 = sshll.u32 %s213_s10, 3 }
 0x671   : > { %s215_s15 = scalar_lea.vmem [#allocation2], %s1850_s11 }
 0x673   : > { %v809_v27 = vpop.f32.mrb[8].mxu1 }
 0x674   : > { %1653 = vrot.lane.b32.xlu0 %v809_v27, %s2235_s16  ;;  %v1966_v6 = vpop.f32.mrb[9].mxu1  ;;  %s1787_s16 = sshll.u32 %s215_s15, 4  ;;  %s2541_s16 = int_to_ptr.vmem [resolvable:$true] %s1787_s16 }
 0x677   : > { %v976_v31 = vpop.f32.mrb[10].mxu1 }
 0x678   : > { %1657 = vrot.lane.b32.xlu1 %v976_v31, %s2236_s30  ;;  %v1976_v34 = vpop.f32.mrb[11].mxu1  ;;  %s2144_s30 = scalar_lea.vmem %s2541_s16, 128 }
 0x679   : > { %p2145_p11 = scmp.ne.s32.totalorder %s2541_s16, %s2144_s30 }
 0x67b   : > { %v1143_v36 = vpop.f32.mrb[12].mxu1  ;;  %p2146_p12 = pnand %p2145_p11, %p2310_p5 }
 0x67c   : > { %1661 = vrot.lane.b32.xlu0 %v1143_v36, %s2237_s6  ;;  %v1986_v37 = vpop.f32.mrb[13].mxu1  ;;  %s2148_s6 = sshll.u32 %s2241_s22, 4  ;;  %s2149_s6 = int_to_ptr.vmem [resolvable:$false] %s2148_s6 }
 0x67d   : > { %p2147_p13 = pneg %p2146_p12  ;;  %p2151_p0 = scmp.lt.s32.totalorder %s2541_s16, %s2149_s6 }
 0x67f   : > { %v1310_v23 = vpop.f32.mrb[14].mxu1 }
 0x680   : > { %1665 = vrot.lane.b32.xlu1 %v1310_v23, %s2238_s7  ;;  %v1996_v3 = vpop.f32.mrb[15].mxu1  ;;  %s2150_s7 = scalar_lea.vmem %s2149_s6, 256 }
 0x681   : > { %p2152_p1 = scmp.lt.s32.totalorder %s2150_s7, %s2144_s30 }
 0x683   : > { %v1477_v38 = vpop.f32.mrb[16].mxu1  ;;  %p2153_p2 = por %p2152_p1, %p2151_p0 }
 0x684   : > { %1669 = vrot.lane.b32.xlu0 %v1477_v38, %s2239_s8  ;;  %v2006_v39 = vpop.f32.mrb[17].mxu1 }
 0x685   : > { %p2154_p3 = pnand %p2153_p2, %p2147_p13 }
 0x687   : > { %v1644_v40 = vpop.f32.mrb[18].mxu1 }
 0x688   : > { %1673 = vrot.lane.b32.xlu1 %v1644_v40, %s2240_s9  ;;  %v2016_v41 = vpop.f32.mrb[19].mxu1 }
 0x6e2   : > { %v1650_v42 = vpop.permute.xlu1 %1649 }
 0x6e3   : > { %v1676_v46 = vsel %vm314_vm2, %v2431_v57, %v1650_v42  ;;  %v1878_v57 = vld [vmem:[%s2586_s4] ss:$0 sm:$0xff] }
 0x6e6   : > { %v1654_v43 = vpop.permute.xlu0 %1653 }
 0x6e7   : > { %v1677_v47 = vsel %vm391_vm4, %v1676_v46, %v1654_v43 }
 0x6ea   : > { %v1658_v44 = vpop.permute.xlu1 %1657 }
 0x6eb   : > { %v1679_v49 = vsel %vm1678_vm5, %v1677_v47, %v1658_v44 }
 0x6ee   : > { %v1662_v45 = vpop.permute.xlu0 %1661 }
 0x6ef   : > { %v1681_v51 = vsel %vm1680_vm6, %v1679_v49, %v1662_v45 }
 0x6f2   : > { %v1666_v48 = vpop.permute.xlu1 %1665 }
 0x6f3   : > { %v1683_v52 = vsel %vm1682_vm7, %v1681_v51, %v1666_v48 }
 0x6f6   : > { %v1670_v50 = vpop.permute.xlu0 %1669 }
 0x6f7   : > { %v1685_v53 = vsel %vm1684_vm8, %v1683_v52, %v1670_v50 }
 0x6fa   : > { %v1674_v54 = vpop.permute.xlu1 %1673 }
 0x6fb   : > { %v1687_v55 = vsel %vm1686_vm9, %v1685_v53, %v1674_v54 }
 0x6fc   : > { %2026 = vmatmul.mubr.msk.f32.vlgmr.msra.gmra.mrb[14].mxu0 %vm232_vm1, %v1687_v55 }
 0x7cf   : > { %v1768_v56 = vpop.f32.mrb[14].mxu0 }
 0x7d0   : > { %v1769_v58 = vadd.f32 %v1878_v57, %v1768_v56  ;;  %v2027_v59 = vpop.f32.mrb[15].mxu0 }
 0x7d2   : > { %1772 = vst.msk [vmem:[%s215_s15] sm:$0xff] %vm232_vm1, %v1769_v58 }
 0x7d3   : > { %2157 = shalt.err (!%p2154_p3)
}
 0x7d4   : > { %s2158_s8 = scalar_lea.hbm %s2539_s25, 128  ;;  %s2162_s11 = scalar_lea.hbm %s2587_s5, 256 }
 0x7d5   : > { %p2159_p4 = scmp.ne.s32.totalorder %s2539_s25, %s2158_s8  ;;  %p2163_p9 = scmp.lt.u32.totalorder %s2539_s25, %s2587_s5 }
 0x7d6   : > { %p2164_p10 = scmp.lt.u32.totalorder %s2162_s11, %s2158_s8  ;;  %p2166_p12 = scmp.lt.u32.totalorder %s2158_s8, %s2539_s25 }
 0x7d7   : > { %p2160_p7 = pnand %p2159_p4, %p2310_p5 }
 0x7d8   : > { %p2165_p11 = por %p2164_p10, %p2163_p9 }
 0x7d9   : > { %p2161_p8 = pneg %p2160_p7 }
 0x7da   : > { %p2167_p13 = por %p2166_p12, %p2165_p11 }
 0x7dc   : > { %p2168_p0 = pnand %p2167_p13, %p2161_p8 }
 0x7de   : > { %2171 = shalt.err (!%p2168_p0)
}
 0x7df   : > { %2040 = dma.vmem_to_hbm [thread:$0]  (%p2310_p5), %s2541_s16, 128, %s2539_s25, %s1774_s26  }
 0x7e0 PF: > { %p2046_p1 = scmp.ge.s32.totalorder %s2206_s21, 2  ;;  %s1799_s14 = sand.u32 1, %s2194_s18  }
 0x7e1   : > { %s1800_s15 = scalar_lea.sflag [#allocation3], %s1799_s14 }
 0x7e2   : > { %p2043_p2 = pnand %p2046_p1, %p2314_p6 }
 0x7e4   : > { %2189 = dma.done.wait (!%p2043_p2), %s1800_s15, 128  }
 0x7e5   : > { %2191 = vsyncadd (!%p2043_p2), %s1800_s15, 4294967168  ;;  %p15_p3 = scmp.ge.s32.totalorder %s2297_s24, 4   ;;  %s2592_s18 = smov %s2198_s19 }
 0x7e6   : > { %s2593_s19 = smov %s2202_s20  ;;  %s2594_s20 = smov %s2308_s27 }
 0x7e7   : > { %s2595_s21 = smov %s2297_s24  ;;  %17 = sbr.rel (!%p15_p3) target bundleno = 3 (0x3), region = 75 }
 0x7ee   :  { %1805 = vsyncpa [#allocation3], 1 }
 0x7ef   :  { %1807 = vsyncpa [#allocation3 + $0x1], 1 }

</bundles_post_ra>
